<compile_context>
chip_gen: v7x
topology: tpu7x:2x2x1
jax: 0.10.0
libtpu: 0.0.40
codegen_flags: <defaults>
</compile_context>

<pallas_src>
import functools
import math

import jax
import jax.numpy as jnp
from jax import lax
from jax.experimental import pallas as pl
from jax.experimental.pallas import tpu as pltpu


def _round_up(x, m):
    return (x + m - 1) // m * m


def _conv_same_kernel(x_ref, w_ref, b_ref, o_ref, slab_ref, oslab_ref, *,
                      H, W, Wp, top, left, Hout, Wout, L_mm,
                      tap_offsets, cin, cin_p, fuse_taps, has_bias):
    """One grid step = one tile of `bt` batch elements.

    x_ref:     (bt, Cin, H*W)         raw (un-padded) input, spatial on lanes
    w_ref:     (Cout, ntaps*cin_p)    flattened conv weight (tap-major, cin)
    b_ref:     (Cout, 1)              bias column (unused if has_bias=False)
    o_ref:     (bt, Cout, Hout*Wout)  valid NCHW output, spatial flattened
    slab_ref:  (cin_p, L_slab)        zero-padded flat input slab (scratch)
    oslab_ref: (Cout, L_mm)           conv output in padded flat coords (scratch)
    """
    bt = x_ref.shape[0]
    cout = o_ref.shape[1]
    ntaps = len(tap_offsets)

    # Zero the slab once per grid step: padding rows/cols/channels and the
    # tail extension stay zero; the interior is fully rewritten per batch
    # element below.  Re-zeroed every step so megacore sharding of the
    # "parallel" batch axis is safe (each core has its own scratch).
    slab_ref[...] = jnp.zeros_like(slab_ref)

    if fuse_taps:
        w_full = w_ref[...]                                  # (Cout, ntaps*cin_p)
    else:
        w_taps = [w_ref[:, pl.ds(t * cin_p, cin_p)] for t in range(ntaps)]

    if has_bias:
        # Hoisted once per step (JAX does not CSE broadcast_in_dim).
        bias_full = jnp.broadcast_to(b_ref[...], (cout, L_mm)).astype(jnp.float32)

    for b in range(bt):                 # bt is small (default 1): cheap unroll
        # ---- in-kernel SAME padding: scatter raw rows into the flat slab ---
        for h in range(H):
            dst = (top + h) * Wp + left
            slab_ref[:cin, pl.ds(dst, W)] = (
                x_ref[b, :, pl.ds(h * W, W)].astype(slab_ref.dtype))

        # ---- convolution as MXU matmul(s) over lane-shifted slab views -----
        if fuse_taps:
            # Tiny Cin: one fused matmul with K = ntaps*cin_p (avoids many
            # tiny-K matmuls).  Taps are static, in-bounds lane-offset views.
            slab = jnp.concatenate(
                [slab_ref[:, pl.ds(off, L_mm)] for off in tap_offsets], axis=0)
            acc = jnp.dot(w_full, slab, preferred_element_type=jnp.float32)
        else:
            # Large Cin: per-tap accumulation (K = cin_p per tap); never
            # materializes the ntaps-x im2col slab (VMEM scaling hazard).
            acc = jnp.zeros((cout, L_mm), jnp.float32)
            for t, off in enumerate(tap_offsets):
                acc = acc + jnp.dot(w_taps[t],
                                    slab_ref[:, pl.ds(off, L_mm)],
                                    preferred_element_type=jnp.float32)
        if has_bias:
            acc = acc + bias_full
        oslab_ref[...] = acc.astype(oslab_ref.dtype)

        # ---- write only the valid interior rows (no wrapper-side slice) ----
        for h in range(Hout):
            o_ref[b, :, pl.ds(h * Wout, Wout)] = oslab_ref[:, pl.ds(h * Wp, Wout)]


def conv2d_static_same_padding(x_nchw, w_oihw, bias=None, *, stride=1,
                               batch_tile=1, compute_dtype=None):
    """Forward pass of Conv2dStaticSamePadding.

    x_nchw: (N, Cin, H, W)              (PyTorch layout)
    w_oihw: (Cout, Cin, kh, kw)         (PyTorch layout)
    bias:   (Cout,) or None
    batch_tile: batch elements per grid step (keep small; default 1 so the
        grid pipelines and shards across v7x TensorCores).
    compute_dtype: None -> bf16 if Cin >= 16 else f32 (f32 accumulation
        always; bf16 output error ~1e-2-level vs an f32 reference).
    Returns (N, Cout, Hout, Wout) in x's dtype, NCHW.
    """
    N, Cin, H, W = x_nchw.shape
    Cout, Cin_w, kh, kw = w_oihw.shape
    if isinstance(stride, int):
        stride = (stride, stride)
    sh, sw = stride
    assert Cin_w == Cin, "groups != 1 not supported"
    assert sh == 1 and sw == 1, "stride != 1 not implemented in the kernel"

    # TF/Keras SAME padding, exactly as Conv2dStaticSamePadding.forward.
    extra_h = (math.ceil(W / sw) - 1) * sw - W + kw
    extra_v = (math.ceil(H / sh) - 1) * sh - H + kh
    left = extra_h // 2
    right = extra_h - left
    top = extra_v // 2
    bottom = extra_v - top
    Hp, Wp = H + top + bottom, W + left + right
    Hout = (Hp - kh) // sh + 1          # == H for stride 1
    Wout = (Wp - kw) // sw + 1          # == W for stride 1

    if compute_dtype is None:
        compute_dtype = jnp.bfloat16 if Cin >= 16 else jnp.float32
    c_item = jnp.dtype(compute_dtype).itemsize

    # Pad Cin to the sublane tile so the fused tap concat is tile aligned.
    sub = (8 * 4) // c_item
    cin_p = _round_up(Cin, sub)
    ntaps = kh * kw

    # Flat-lane geometry: the conv output at padded-grid (y, x) lives at flat
    # lane y*Wp + x; only y < Hout, x < Wout are valid and only those are
    # written to HBM.  Tap (ky, kx) reads the slab at static offset ky*Wp+kx,
    # so the slab needs a zero tail covering L_mm + ext lanes.
    L = Hp * Wp
    ext = (kh - 1) * Wp + (kw - 1)
    L_need = (Hout - 1) * Wp + Wout             # last lane any valid output uses
    L_mm = _round_up(L_need, 128)               # matmul lane width (full vregs)
    L_slab = _round_up(max(L, L_mm + ext), 128)

    tap_offsets = tuple(ky * Wp + kx for ky in range(kh) for kx in range(kw))

    # (Cout, Cin, kh, kw) -> (Cout, ntaps*cin_p); column order (ky, kx, cin)
    # matches both kernel contraction paths.
    w_p = jnp.pad(w_oihw, ((0, 0), (0, cin_p - Cin), (0, 0), (0, 0)))
    w_flat = jnp.transpose(w_p, (0, 2, 3, 1)).reshape(
        Cout, ntaps * cin_p).astype(compute_dtype)

    has_bias = bias is not None
    if bias is None:
        bias = jnp.zeros((Cout,), jnp.float32)
    b_col = bias.reshape(Cout, 1).astype(jnp.float32)

    # Layout-preserving reshapes only (no extra HBM passes): SAME padding is
    # done in VMEM inside the kernel, and the kernel writes only the valid
    # interior, so no wrapper jnp.pad of x and no interior slice of the output.
    x_flat = x_nchw.reshape(N, Cin, H * W)

    bt = batch_tile
    assert N % bt == 0, "batch must be divisible by batch_tile"
    grid = (N // bt,)            # >= 2 steps -> DMA/compute overlap + 2 v7x TCs

    out_dtype = x_nchw.dtype
    fuse_taps = cin_p < 128      # tiny Cin: single fused K=ntaps*cin_p matmul

    # Explicit VMEM budget (double-buffered blocks + scratch) with headroom;
    # v5e's scoped default is only 16 MiB, v7x physical VMEM is 64 MiB.
    step_bytes = (2 * bt * Cin * H * W * x_nchw.dtype.itemsize
                  + 2 * bt * Cout * Hout * Wout * jnp.dtype(out_dtype).itemsize
                  + 2 * Cout * ntaps * cin_p * c_item
                  + 2 * Cout * 4
                  + cin_p * L_slab * c_item
                  + Cout * L_mm * 4)
    vmem_limit = int(min(64 * 2 ** 20, max(8 * 2 ** 20, 2 * step_bytes)))

    grid_spec = pltpu.PrefetchScalarGridSpec(
        num_scalar_prefetch=0,
        grid=grid,
        in_specs=[
            pl.BlockSpec((bt, Cin, H * W), lambda n: (n, 0, 0)),
            pl.BlockSpec((Cout, ntaps * cin_p), lambda n: (0, 0)),
            pl.BlockSpec((Cout, 1), lambda n: (0, 0)),
        ],
        out_specs=pl.BlockSpec((bt, Cout, Hout * Wout), lambda n: (n, 0, 0)),
        scratch_shapes=[
            pltpu.VMEM((cin_p, L_slab), compute_dtype),
            pltpu.VMEM((Cout, L_mm), out_dtype),
        ],
    )

    kernel = functools.partial(
        _conv_same_kernel, H=H, W=W, Wp=Wp, top=top, left=left,
        Hout=Hout, Wout=Wout, L_mm=L_mm, tap_offsets=tap_offsets,
        cin=Cin, cin_p=cin_p, fuse_taps=fuse_taps, has_bias=has_bias)

    out_flat = pl.pallas_call(
        kernel,
        out_shape=jax.ShapeDtypeStruct((N, Cout, Hout * Wout), out_dtype),
        grid_spec=grid_spec,
        compiler_params=pltpu.CompilerParams(
            dimension_semantics=("parallel",),
            vmem_limit_bytes=vmem_limit),
    )(x_flat, w_flat, b_col)

    return out_flat.reshape(N, Cout, Hout, Wout)


def _reference_conv_same(x_nchw, w_oihw, bias, stride=(1, 1)):
    """Pure-JAX reference mirroring F.pad + nn.Conv2d of the module."""
    _, _, H, W = x_nchw.shape
    kh, kw = w_oihw.shape[2], w_oihw.shape[3]
    sh, sw = stride
    extra_h = (math.ceil(W / sw) - 1) * sw - W + kw
    extra_v = (math.ceil(H / sh) - 1) * sh - H + kh
    left = extra_h // 2
    right = extra_h - left
    top = extra_v // 2
    bottom = extra_v - top
    x_pad = jnp.pad(x_nchw, ((0, 0), (0, 0), (top, bottom), (left, right)))
    dn = lax.conv_dimension_numbers(x_pad.shape, w_oihw.shape,
                                    ("NCHW", "OIHW", "NCHW"))
    out = lax.conv_general_dilated(x_pad, w_oihw, (sh, sw), "VALID",
                                   dimension_numbers=dn)
    return out + bias.reshape(1, -1, 1, 1)


if __name__ == "__main__":
    # Conv2dStaticSamePadding(in_channels=4, out_channels=8, kernel_size=3,
    #                         stride=1, bias=True)  -- fused-slab path.
    N, Cin, Cout, H, W, K = 2, 4, 8, 16, 16, 3
    key = jax.random.PRNGKey(0)
    kx, kw_, kb = jax.random.split(key, 3)
    x = jax.random.normal(kx, (N, Cin, H, W), jnp.float32)
    w = jax.random.normal(kw_, (Cout, Cin, K, K), jnp.float32) * 0.1
    b = jax.random.normal(kb, (Cout,), jnp.float32) * 0.1

    out = conv2d_static_same_padding(x, w, b, stride=1)
    out = jax.block_until_ready(out)
    ref = _reference_conv_same(x, w, b, stride=(1, 1))
    assert out.shape == ref.shape, (out.shape, ref.shape)
    assert jnp.allclose(out, ref, atol=1e-4, rtol=1e-4), (
        float(jnp.max(jnp.abs(out - ref))))

    # Second shape exercises the per-tap (large-Cin, no im2col slab) path.
    N2, Cin2, Cout2, H2, W2 = 2, 128, 8, 8, 8
    k2x, k2w, k2b = jax.random.split(jax.random.PRNGKey(1), 3)
    x2 = jax.random.normal(k2x, (N2, Cin2, H2, W2), jnp.float32)
    w2 = jax.random.normal(k2w, (Cout2, Cin2, K, K), jnp.float32) * 0.1
    b2 = jax.random.normal(k2b, (Cout2,), jnp.float32) * 0.1
    out2 = jax.block_until_ready(
        conv2d_static_same_padding(x2, w2, b2, stride=1,
                                   compute_dtype=jnp.float32))
    ref2 = _reference_conv_same(x2, w2, b2, stride=(1, 1))
    assert out2.shape == ref2.shape, (out2.shape, ref2.shape)
    assert jnp.allclose(out2, ref2, atol=1e-3, rtol=1e-3), (
        float(jnp.max(jnp.abs(out2 - ref2))))

    print("KERNEL_OK")
</pallas_src>

<mosaic_0001>
module attributes {stable_mosaic.version = 11 : i64} {
  func.func @_conv_same_kernel(%arg0: i32, %arg1: memref<1x4x256xf32, #tpu.memory_space<vmem>>, %arg2: memref<8x72xf32, #tpu.memory_space<vmem>>, %arg3: memref<8x1xf32, #tpu.memory_space<vmem>>, %arg4: memref<1x8x256xf32, #tpu.memory_space<vmem>>, %arg5: memref<8x512xf32, #tpu.memory_space<vmem>>, %arg6: memref<8x384xf32, #tpu.memory_space<vmem>>) attributes {dimension_semantics = [#tpu.dimension_semantics<parallel>], iteration_bounds = array<i64: 2>, scalar_prefetch = 0 : i64, scratch_operands = 2 : i64, tpu.core_type = #tpu.core_type<tc>, window_params = [{transform_indices = @transform_0, window_bounds = array<i64: 1, 4, 256>}, {pipeline_mode = #tpu.pipeline_mode<synchronous>, transform_indices = @transform_1, window_bounds = array<i64: 8, 72>}, {pipeline_mode = #tpu.pipeline_mode<synchronous>, transform_indices = @transform_2, window_bounds = array<i64: 8, 1>}, {transform_indices = @transform_3, window_bounds = array<i64: 1, 8, 256>}]} {
    %cst = arith.constant 0.000000e+00 : f32
    %0 = vector.broadcast %cst : f32 to vector<8x512xf32>
    %c0 = arith.constant 0 : index
    %c0_0 = arith.constant 0 : index
    %1 = vector.load %arg5[%c0, %c0_0] : memref<8x512xf32, #tpu.memory_space<vmem>>, vector<8x512xf32>
    tpu.vector_store %arg5[%c0, %c0_0], %0 {strides = array<i32>} : memref<8x512xf32, #tpu.memory_space<vmem>>, vector<8x512xf32>,
    %c0_1 = arith.constant 0 : index
    %c0_2 = arith.constant 0 : index
    %2 = vector.load %arg2[%c0_1, %c0_2] : memref<8x72xf32, #tpu.memory_space<vmem>>, vector<8x72xf32>
    %c0_3 = arith.constant 0 : index
    %c0_4 = arith.constant 0 : index
    %3 = vector.load %arg3[%c0_3, %c0_4] : memref<8x1xf32, #tpu.memory_space<vmem>>, vector<8x1xf32>
    %4 = vector.shape_cast %3 : vector<8x1xf32> to vector<8x1xf32>
    %5 = vector.broadcast %4 : vector<8x1xf32> to vector<8x384xf32>
    %c0_5 = arith.constant 0 : index
    %c0_6 = arith.constant 0 : index
    %c0_7 = arith.constant 0 : index
    %6 = vector.load %arg1[%c0_5, %c0_6, %c0_7] : memref<1x4x256xf32, #tpu.memory_space<vmem>>, vector<1x4x16xf32>
    %7 = vector.shape_cast %6 : vector<1x4x16xf32> to vector<4x16xf32>
    %c0_8 = arith.constant 0 : index
    %c19 = arith.constant 19 : index
    %8 = vector.load %arg5[%c0_8, %c19] : memref<8x512xf32, #tpu.memory_space<vmem>>, vector<4x16xf32>
    tpu.vector_store %arg5[%c0_8, %c19], %7 {strides = array<i32>} : memref<8x512xf32, #tpu.memory_space<vmem>>, vector<4x16xf32>,
    %c0_9 = arith.constant 0 : index
    %c0_10 = arith.constant 0 : index
    %c16 = arith.constant 16 : index
    %9 = vector.load %arg1[%c0_9, %c0_10, %c16] : memref<1x4x256xf32, #tpu.memory_space<vmem>>, vector<1x4x16xf32>
    %10 = vector.shape_cast %9 : vector<1x4x16xf32> to vector<4x16xf32>
    %c0_11 = arith.constant 0 : index
    %c37 = arith.constant 37 : index
    %11 = vector.load %arg5[%c0_11, %c37] : memref<8x512xf32, #tpu.memory_space<vmem>>, vector<4x16xf32>
    tpu.vector_store %arg5[%c0_11, %c37], %10 {strides = array<i32>} : memref<8x512xf32, #tpu.memory_space<vmem>>, vector<4x16xf32>,
    %c0_12 = arith.constant 0 : index
    %c0_13 = arith.constant 0 : index
    %c32 = arith.constant 32 : index
    %12 = vector.load %arg1[%c0_12, %c0_13, %c32] : memref<1x4x256xf32, #tpu.memory_space<vmem>>, vector<1x4x16xf32>
    %13 = vector.shape_cast %12 : vector<1x4x16xf32> to vector<4x16xf32>
    %c0_14 = arith.constant 0 : index
    %c55 = arith.constant 55 : index
    %14 = vector.load %arg5[%c0_14, %c55] : memref<8x512xf32, #tpu.memory_space<vmem>>, vector<4x16xf32>
    tpu.vector_store %arg5[%c0_14, %c55], %13 {strides = array<i32>} : memref<8x512xf32, #tpu.memory_space<vmem>>, vector<4x16xf32>,
    %c0_15 = arith.constant 0 : index
    %c0_16 = arith.constant 0 : index
    %c48 = arith.constant 48 : index
    %15 = vector.load %arg1[%c0_15, %c0_16, %c48] : memref<1x4x256xf32, #tpu.memory_space<vmem>>, vector<1x4x16xf32>
    %16 = vector.shape_cast %15 : vector<1x4x16xf32> to vector<4x16xf32>
    %c0_17 = arith.constant 0 : index
    %c73 = arith.constant 73 : index
    %17 = vector.load %arg5[%c0_17, %c73] : memref<8x512xf32, #tpu.memory_space<vmem>>, vector<4x16xf32>
    tpu.vector_store %arg5[%c0_17, %c73], %16 {strides = array<i32>} : memref<8x512xf32, #tpu.memory_space<vmem>>, vector<4x16xf32>,
    %c0_18 = arith.constant 0 : index
    %c0_19 = arith.constant 0 : index
    %c64 = arith.constant 64 : index
    %18 = vector.load %arg1[%c0_18, %c0_19, %c64] : memref<1x4x256xf32, #tpu.memory_space<vmem>>, vector<1x4x16xf32>
    %19 = vector.shape_cast %18 : vector<1x4x16xf32> to vector<4x16xf32>
    %c0_20 = arith.constant 0 : index
    %c91 = arith.constant 91 : index
    %20 = vector.load %arg5[%c0_20, %c91] : memref<8x512xf32, #tpu.memory_space<vmem>>, vector<4x16xf32>
    tpu.vector_store %arg5[%c0_20, %c91], %19 {strides = array<i32>} : memref<8x512xf32, #tpu.memory_space<vmem>>, vector<4x16xf32>,
    %c0_21 = arith.constant 0 : index
    %c0_22 = arith.constant 0 : index
    %c80 = arith.constant 80 : index
    %21 = vector.load %arg1[%c0_21, %c0_22, %c80] : memref<1x4x256xf32, #tpu.memory_space<vmem>>, vector<1x4x16xf32>
    %22 = vector.shape_cast %21 : vector<1x4x16xf32> to vector<4x16xf32>
    %c0_23 = arith.constant 0 : index
    %c109 = arith.constant 109 : index
    %23 = vector.load %arg5[%c0_23, %c109] : memref<8x512xf32, #tpu.memory_space<vmem>>, vector<4x16xf32>
    tpu.vector_store %arg5[%c0_23, %c109], %22 {strides = array<i32>} : memref<8x512xf32, #tpu.memory_space<vmem>>, vector<4x16xf32>,
    %c0_24 = arith.constant 0 : index
    %c0_25 = arith.constant 0 : index
    %c96 = arith.constant 96 : index
    %24 = vector.load %arg1[%c0_24, %c0_25, %c96] : memref<1x4x256xf32, #tpu.memory_space<vmem>>, vector<1x4x16xf32>
    %25 = vector.shape_cast %24 : vector<1x4x16xf32> to vector<4x16xf32>
    %c0_26 = arith.constant 0 : index
    %c127 = arith.constant 127 : index
    %26 = vector.load %arg5[%c0_26, %c127] : memref<8x512xf32, #tpu.memory_space<vmem>>, vector<4x16xf32>
    tpu.vector_store %arg5[%c0_26, %c127], %25 {strides = array<i32>} : memref<8x512xf32, #tpu.memory_space<vmem>>, vector<4x16xf32>,
    %c0_27 = arith.constant 0 : index
    %c0_28 = arith.constant 0 : index
    %c112 = arith.constant 112 : index
    %27 = vector.load %arg1[%c0_27, %c0_28, %c112] : memref<1x4x256xf32, #tpu.memory_space<vmem>>, vector<1x4x16xf32>
    %28 = vector.shape_cast %27 : vector<1x4x16xf32> to vector<4x16xf32>
    %c0_29 = arith.constant 0 : index
    %c145 = arith.constant 145 : index
    %29 = vector.load %arg5[%c0_29, %c145] : memref<8x512xf32, #tpu.memory_space<vmem>>, vector<4x16xf32>
    tpu.vector_store %arg5[%c0_29, %c145], %28 {strides = array<i32>} : memref<8x512xf32, #tpu.memory_space<vmem>>, vector<4x16xf32>,
    %c0_30 = arith.constant 0 : index
    %c0_31 = arith.constant 0 : index
    %c128 = arith.constant 128 : index
    %30 = vector.load %arg1[%c0_30, %c0_31, %c128] : memref<1x4x256xf32, #tpu.memory_space<vmem>>, vector<1x4x16xf32>
    %31 = vector.shape_cast %30 : vector<1x4x16xf32> to vector<4x16xf32>
    %c0_32 = arith.constant 0 : index
    %c163 = arith.constant 163 : index
    %32 = vector.load %arg5[%c0_32, %c163] : memref<8x512xf32, #tpu.memory_space<vmem>>, vector<4x16xf32>
    tpu.vector_store %arg5[%c0_32, %c163], %31 {strides = array<i32>} : memref<8x512xf32, #tpu.memory_space<vmem>>, vector<4x16xf32>,
    %c0_33 = arith.constant 0 : index
    %c0_34 = arith.constant 0 : index
    %c144 = arith.constant 144 : index
    %33 = vector.load %arg1[%c0_33, %c0_34, %c144] : memref<1x4x256xf32, #tpu.memory_space<vmem>>, vector<1x4x16xf32>
    %34 = vector.shape_cast %33 : vector<1x4x16xf32> to vector<4x16xf32>
    %c0_35 = arith.constant 0 : index
    %c181 = arith.constant 181 : index
    %35 = vector.load %arg5[%c0_35, %c181] : memref<8x512xf32, #tpu.memory_space<vmem>>, vector<4x16xf32>
    tpu.vector_store %arg5[%c0_35, %c181], %34 {strides = array<i32>} : memref<8x512xf32, #tpu.memory_space<vmem>>, vector<4x16xf32>,
    %c0_36 = arith.constant 0 : index
    %c0_37 = arith.constant 0 : index
    %c160 = arith.constant 160 : index
    %36 = vector.load %arg1[%c0_36, %c0_37, %c160] : memref<1x4x256xf32, #tpu.memory_space<vmem>>, vector<1x4x16xf32>
    %37 = vector.shape_cast %36 : vector<1x4x16xf32> to vector<4x16xf32>
    %c0_38 = arith.constant 0 : index
    %c199 = arith.constant 199 : index
    %38 = vector.load %arg5[%c0_38, %c199] : memref<8x512xf32, #tpu.memory_space<vmem>>, vector<4x16xf32>
    tpu.vector_store %arg5[%c0_38, %c199], %37 {strides = array<i32>} : memref<8x512xf32, #tpu.memory_space<vmem>>, vector<4x16xf32>,
    %c0_39 = arith.constant 0 : index
    %c0_40 = arith.constant 0 : index
    %c176 = arith.constant 176 : index
    %39 = vector.load %arg1[%c0_39, %c0_40, %c176] : memref<1x4x256xf32, #tpu.memory_space<vmem>>, vector<1x4x16xf32>
    %40 = vector.shape_cast %39 : vector<1x4x16xf32> to vector<4x16xf32>
    %c0_41 = arith.constant 0 : index
    %c217 = arith.constant 217 : index
    %41 = vector.load %arg5[%c0_41, %c217] : memref<8x512xf32, #tpu.memory_space<vmem>>, vector<4x16xf32>
    tpu.vector_store %arg5[%c0_41, %c217], %40 {strides = array<i32>} : memref<8x512xf32, #tpu.memory_space<vmem>>, vector<4x16xf32>,
    %c0_42 = arith.constant 0 : index
    %c0_43 = arith.constant 0 : index
    %c192 = arith.constant 192 : index
    %42 = vector.load %arg1[%c0_42, %c0_43, %c192] : memref<1x4x256xf32, #tpu.memory_space<vmem>>, vector<1x4x16xf32>
    %43 = vector.shape_cast %42 : vector<1x4x16xf32> to vector<4x16xf32>
    %c0_44 = arith.constant 0 : index
    %c235 = arith.constant 235 : index
    %44 = vector.load %arg5[%c0_44, %c235] : memref<8x512xf32, #tpu.memory_space<vmem>>, vector<4x16xf32>
    tpu.vector_store %arg5[%c0_44, %c235], %43 {strides = array<i32>} : memref<8x512xf32, #tpu.memory_space<vmem>>, vector<4x16xf32>,
    %c0_45 = arith.constant 0 : index
    %c0_46 = arith.constant 0 : index
    %c208 = arith.constant 208 : index
    %45 = vector.load %arg1[%c0_45, %c0_46, %c208] : memref<1x4x256xf32, #tpu.memory_space<vmem>>, vector<1x4x16xf32>
    %46 = vector.shape_cast %45 : vector<1x4x16xf32> to vector<4x16xf32>
    %c0_47 = arith.constant 0 : index
    %c253 = arith.constant 253 : index
    %47 = vector.load %arg5[%c0_47, %c253] : memref<8x512xf32, #tpu.memory_space<vmem>>, vector<4x16xf32>
    tpu.vector_store %arg5[%c0_47, %c253], %46 {strides = array<i32>} : memref<8x512xf32, #tpu.memory_space<vmem>>, vector<4x16xf32>,
    %c0_48 = arith.constant 0 : index
    %c0_49 = arith.constant 0 : index
    %c224 = arith.constant 224 : index
    %48 = vector.load %arg1[%c0_48, %c0_49, %c224] : memref<1x4x256xf32, #tpu.memory_space<vmem>>, vector<1x4x16xf32>
    %49 = vector.shape_cast %48 : vector<1x4x16xf32> to vector<4x16xf32>
    %c0_50 = arith.constant 0 : index
    %c271 = arith.constant 271 : index
    %50 = vector.load %arg5[%c0_50, %c271] : memref<8x512xf32, #tpu.memory_space<vmem>>, vector<4x16xf32>
    tpu.vector_store %arg5[%c0_50, %c271], %49 {strides = array<i32>} : memref<8x512xf32, #tpu.memory_space<vmem>>, vector<4x16xf32>,
    %c0_51 = arith.constant 0 : index
    %c0_52 = arith.constant 0 : index
    %c240 = arith.constant 240 : index
    %51 = vector.load %arg1[%c0_51, %c0_52, %c240] : memref<1x4x256xf32, #tpu.memory_space<vmem>>, vector<1x4x16xf32>
    %52 = vector.shape_cast %51 : vector<1x4x16xf32> to vector<4x16xf32>
    %c0_53 = arith.constant 0 : index
    %c289 = arith.constant 289 : index
    %53 = vector.load %arg5[%c0_53, %c289] : memref<8x512xf32, #tpu.memory_space<vmem>>, vector<4x16xf32>
    tpu.vector_store %arg5[%c0_53, %c289], %52 {strides = array<i32>} : memref<8x512xf32, #tpu.memory_space<vmem>>, vector<4x16xf32>,
    %c0_54 = arith.constant 0 : index
    %c0_55 = arith.constant 0 : index
    %54 = vector.load %arg5[%c0_54, %c0_55] : memref<8x512xf32, #tpu.memory_space<vmem>>, vector<8x384xf32>
    %c0_56 = arith.constant 0 : index
    %c1 = arith.constant 1 : index
    %55 = vector.load %arg5[%c0_56, %c1] : memref<8x512xf32, #tpu.memory_space<vmem>>, vector<8x384xf32>
    %c0_57 = arith.constant 0 : index
    %c2 = arith.constant 2 : index
    %56 = vector.load %arg5[%c0_57, %c2] : memref<8x512xf32, #tpu.memory_space<vmem>>, vector<8x384xf32>
    %c0_58 = arith.constant 0 : index
    %c18 = arith.constant 18 : index
    %57 = vector.load %arg5[%c0_58, %c18] : memref<8x512xf32, #tpu.memory_space<vmem>>, vector<8x384xf32>
    %c0_59 = arith.constant 0 : index
    %c19_60 = arith.constant 19 : index
    %58 = vector.load %arg5[%c0_59, %c19_60] : memref<8x512xf32, #tpu.memory_space<vmem>>, vector<8x384xf32>
    %c0_61 = arith.constant 0 : index
    %c20 = arith.constant 20 : index
    %59 = vector.load %arg5[%c0_61, %c20] : memref<8x512xf32, #tpu.memory_space<vmem>>, vector<8x384xf32>
    %c0_62 = arith.constant 0 : index
    %c36 = arith.constant 36 : index
    %60 = vector.load %arg5[%c0_62, %c36] : memref<8x512xf32, #tpu.memory_space<vmem>>, vector<8x384xf32>
    %c0_63 = arith.constant 0 : index
    %c37_64 = arith.constant 37 : index
    %61 = vector.load %arg5[%c0_63, %c37_64] : memref<8x512xf32, #tpu.memory_space<vmem>>, vector<8x384xf32>
    %c0_65 = arith.constant 0 : index
    %c38 = arith.constant 38 : index
    %62 = vector.load %arg5[%c0_65, %c38] : memref<8x512xf32, #tpu.memory_space<vmem>>, vector<8x384xf32>
    %63 = tpu.concatenate %54, %55, %56, %57, %58, %59, %60, %61, %62 in 0 : vector<8x384xf32>, vector<8x384xf32>, vector<8x384xf32>, vector<8x384xf32>, vector<8x384xf32>, vector<8x384xf32>, vector<8x384xf32>, vector<8x384xf32>, vector<8x384xf32> -> vector<72x384xf32>
    %cst_66 = arith.constant dense<0.000000e+00> : vector<8x384xf32>
    %64 = tpu.matmul %2, %63, %cst_66 {dimension_numbers = #tpu.dot_dimension_numbers<[1], [0], [0], [1], [0, 0, 1, 1], [], []>} : vector<8x72xf32>, vector<72x384xf32>, vector<8x384xf32> -> vector<8x384xf32>
    %65 = arith.addf %64, %5 : vector<8x384xf32>
    %c0_67 = arith.constant 0 : index
    %c0_68 = arith.constant 0 : index
    %66 = vector.load %arg6[%c0_67, %c0_68] : memref<8x384xf32, #tpu.memory_space<vmem>>, vector<8x384xf32>
    tpu.vector_store %arg6[%c0_67, %c0_68], %65 {strides = array<i32>} : memref<8x384xf32, #tpu.memory_space<vmem>>, vector<8x384xf32>,
    %c0_69 = arith.constant 0 : index
    %c0_70 = arith.constant 0 : index
    %67 = vector.load %arg6[%c0_69, %c0_70] : memref<8x384xf32, #tpu.memory_space<vmem>>, vector<8x16xf32>
    %c0_71 = arith.constant 0 : index
    %c0_72 = arith.constant 0 : index
    %c0_73 = arith.constant 0 : index
    %68 = vector.load %arg4[%c0_71, %c0_72, %c0_73] : memref<1x8x256xf32, #tpu.memory_space<vmem>>, vector<1x8x16xf32>
    %69 = vector.shape_cast %68 : vector<1x8x16xf32> to vector<8x16xf32>
    %70 = vector.shape_cast %67 : vector<8x16xf32> to vector<1x8x16xf32>
    tpu.vector_store %arg4[%c0_71, %c0_72, %c0_73], %70 {strides = array<i32>} : memref<1x8x256xf32, #tpu.memory_space<vmem>>, vector<1x8x16xf32>,
    %c0_74 = arith.constant 0 : index
    %c18_75 = arith.constant 18 : index
    %71 = vector.load %arg6[%c0_74, %c18_75] : memref<8x384xf32, #tpu.memory_space<vmem>>, vector<8x16xf32>
    %c0_76 = arith.constant 0 : index
    %c0_77 = arith.constant 0 : index
    %c16_78 = arith.constant 16 : index
    %72 = vector.load %arg4[%c0_76, %c0_77, %c16_78] : memref<1x8x256xf32, #tpu.memory_space<vmem>>, vector<1x8x16xf32>
    %73 = vector.shape_cast %72 : vector<1x8x16xf32> to vector<8x16xf32>
    %74 = vector.shape_cast %71 : vector<8x16xf32> to vector<1x8x16xf32>
    tpu.vector_store %arg4[%c0_76, %c0_77, %c16_78], %74 {strides = array<i32>} : memref<1x8x256xf32, #tpu.memory_space<vmem>>, vector<1x8x16xf32>,
    %c0_79 = arith.constant 0 : index
    %c36_80 = arith.constant 36 : index
    %75 = vector.load %arg6[%c0_79, %c36_80] : memref<8x384xf32, #tpu.memory_space<vmem>>, vector<8x16xf32>
    %c0_81 = arith.constant 0 : index
    %c0_82 = arith.constant 0 : index
    %c32_83 = arith.constant 32 : index
    %76 = vector.load %arg4[%c0_81, %c0_82, %c32_83] : memref<1x8x256xf32, #tpu.memory_space<vmem>>, vector<1x8x16xf32>
    %77 = vector.shape_cast %76 : vector<1x8x16xf32> to vector<8x16xf32>
    %78 = vector.shape_cast %75 : vector<8x16xf32> to vector<1x8x16xf32>
    tpu.vector_store %arg4[%c0_81, %c0_82, %c32_83], %78 {strides = array<i32>} : memref<1x8x256xf32, #tpu.memory_space<vmem>>, vector<1x8x16xf32>,
    %c0_84 = arith.constant 0 : index
    %c54 = arith.constant 54 : index
    %79 = vector.load %arg6[%c0_84, %c54] : memref<8x384xf32, #tpu.memory_space<vmem>>, vector<8x16xf32>
    %c0_85 = arith.constant 0 : index
    %c0_86 = arith.constant 0 : index
    %c48_87 = arith.constant 48 : index
    %80 = vector.load %arg4[%c0_85, %c0_86, %c48_87] : memref<1x8x256xf32, #tpu.memory_space<vmem>>, vector<1x8x16xf32>
    %81 = vector.shape_cast %80 : vector<1x8x16xf32> to vector<8x16xf32>
    %82 = vector.shape_cast %79 : vector<8x16xf32> to vector<1x8x16xf32>
    tpu.vector_store %arg4[%c0_85, %c0_86, %c48_87], %82 {strides = array<i32>} : memref<1x8x256xf32, #tpu.memory_space<vmem>>, vector<1x8x16xf32>,
    %c0_88 = arith.constant 0 : index
    %c72 = arith.constant 72 : index
    %83 = vector.load %arg6[%c0_88, %c72] : memref<8x384xf32, #tpu.memory_space<vmem>>, vector<8x16xf32>
    %c0_89 = arith.constant 0 : index
    %c0_90 = arith.constant 0 : index
    %c64_91 = arith.constant 64 : index
    %84 = vector.load %arg4[%c0_89, %c0_90, %c64_91] : memref<1x8x256xf32, #tpu.memory_space<vmem>>, vector<1x8x16xf32>
    %85 = vector.shape_cast %84 : vector<1x8x16xf32> to vector<8x16xf32>
    %86 = vector.shape_cast %83 : vector<8x16xf32> to vector<1x8x16xf32>
    tpu.vector_store %arg4[%c0_89, %c0_90, %c64_91], %86 {strides = array<i32>} : memref<1x8x256xf32, #tpu.memory_space<vmem>>, vector<1x8x16xf32>,
    %c0_92 = arith.constant 0 : index
    %c90 = arith.constant 90 : index
    %87 = vector.load %arg6[%c0_92, %c90] : memref<8x384xf32, #tpu.memory_space<vmem>>, vector<8x16xf32>
    %c0_93 = arith.constant 0 : index
    %c0_94 = arith.constant 0 : index
    %c80_95 = arith.constant 80 : index
    %88 = vector.load %arg4[%c0_93, %c0_94, %c80_95] : memref<1x8x256xf32, #tpu.memory_space<vmem>>, vector<1x8x16xf32>
    %89 = vector.shape_cast %88 : vector<1x8x16xf32> to vector<8x16xf32>
    %90 = vector.shape_cast %87 : vector<8x16xf32> to vector<1x8x16xf32>
    tpu.vector_store %arg4[%c0_93, %c0_94, %c80_95], %90 {strides = array<i32>} : memref<1x8x256xf32, #tpu.memory_space<vmem>>, vector<1x8x16xf32>,
    %c0_96 = arith.constant 0 : index
    %c108 = arith.constant 108 : index
    %91 = vector.load %arg6[%c0_96, %c108] : memref<8x384xf32, #tpu.memory_space<vmem>>, vector<8x16xf32>
    %c0_97 = arith.constant 0 : index
    %c0_98 = arith.constant 0 : index
    %c96_99 = arith.constant 96 : index
    %92 = vector.load %arg4[%c0_97, %c0_98, %c96_99] : memref<1x8x256xf32, #tpu.memory_space<vmem>>, vector<1x8x16xf32>
    %93 = vector.shape_cast %92 : vector<1x8x16xf32> to vector<8x16xf32>
    %94 = vector.shape_cast %91 : vector<8x16xf32> to vector<1x8x16xf32>
    tpu.vector_store %arg4[%c0_97, %c0_98, %c96_99], %94 {strides = array<i32>} : memref<1x8x256xf32, #tpu.memory_space<vmem>>, vector<1x8x16xf32>,
    %c0_100 = arith.constant 0 : index
    %c126 = arith.constant 126 : index
    %95 = vector.load %arg6[%c0_100, %c126] : memref<8x384xf32, #tpu.memory_space<vmem>>, vector<8x16xf32>
    %c0_101 = arith.constant 0 : index
    %c0_102 = arith.constant 0 : index
    %c112_103 = arith.constant 112 : index
    %96 = vector.load %arg4[%c0_101, %c0_102, %c112_103] : memref<1x8x256xf32, #tpu.memory_space<vmem>>, vector<1x8x16xf32>
    %97 = vector.shape_cast %96 : vector<1x8x16xf32> to vector<8x16xf32>
    %98 = vector.shape_cast %95 : vector<8x16xf32> to vector<1x8x16xf32>
    tpu.vector_store %arg4[%c0_101, %c0_102, %c112_103], %98 {strides = array<i32>} : memref<1x8x256xf32, #tpu.memory_space<vmem>>, vector<1x8x16xf32>,
    %c0_104 = arith.constant 0 : index
    %c144_105 = arith.constant 144 : index
    %99 = vector.load %arg6[%c0_104, %c144_105] : memref<8x384xf32, #tpu.memory_space<vmem>>, vector<8x16xf32>
    %c0_106 = arith.constant 0 : index
    %c0_107 = arith.constant 0 : index
    %c128_108 = arith.constant 128 : index
    %100 = vector.load %arg4[%c0_106, %c0_107, %c128_108] : memref<1x8x256xf32, #tpu.memory_space<vmem>>, vector<1x8x16xf32>
    %101 = vector.shape_cast %100 : vector<1x8x16xf32> to vector<8x16xf32>
    %102 = vector.shape_cast %99 : vector<8x16xf32> to vector<1x8x16xf32>
    tpu.vector_store %arg4[%c0_106, %c0_107, %c128_108], %102 {strides = array<i32>} : memref<1x8x256xf32, #tpu.memory_space<vmem>>, vector<1x8x16xf32>,
    %c0_109 = arith.constant 0 : index
    %c162 = arith.constant 162 : index
    %103 = vector.load %arg6[%c0_109, %c162] : memref<8x384xf32, #tpu.memory_space<vmem>>, vector<8x16xf32>
    %c0_110 = arith.constant 0 : index
    %c0_111 = arith.constant 0 : index
    %c144_112 = arith.constant 144 : index
    %104 = vector.load %arg4[%c0_110, %c0_111, %c144_112] : memref<1x8x256xf32, #tpu.memory_space<vmem>>, vector<1x8x16xf32>
    %105 = vector.shape_cast %104 : vector<1x8x16xf32> to vector<8x16xf32>
    %106 = vector.shape_cast %103 : vector<8x16xf32> to vector<1x8x16xf32>
    tpu.vector_store %arg4[%c0_110, %c0_111, %c144_112], %106 {strides = array<i32>} : memref<1x8x256xf32, #tpu.memory_space<vmem>>, vector<1x8x16xf32>,
    %c0_113 = arith.constant 0 : index
    %c180 = arith.constant 180 : index
    %107 = vector.load %arg6[%c0_113, %c180] : memref<8x384xf32, #tpu.memory_space<vmem>>, vector<8x16xf32>
    %c0_114 = arith.constant 0 : index
    %c0_115 = arith.constant 0 : index
    %c160_116 = arith.constant 160 : index
    %108 = vector.load %arg4[%c0_114, %c0_115, %c160_116] : memref<1x8x256xf32, #tpu.memory_space<vmem>>, vector<1x8x16xf32>
    %109 = vector.shape_cast %108 : vector<1x8x16xf32> to vector<8x16xf32>
    %110 = vector.shape_cast %107 : vector<8x16xf32> to vector<1x8x16xf32>
    tpu.vector_store %arg4[%c0_114, %c0_115, %c160_116], %110 {strides = array<i32>} : memref<1x8x256xf32, #tpu.memory_space<vmem>>, vector<1x8x16xf32>,
    %c0_117 = arith.constant 0 : index
    %c198 = arith.constant 198 : index
    %111 = vector.load %arg6[%c0_117, %c198] : memref<8x384xf32, #tpu.memory_space<vmem>>, vector<8x16xf32>
    %c0_118 = arith.constant 0 : index
    %c0_119 = arith.constant 0 : index
    %c176_120 = arith.constant 176 : index
    %112 = vector.load %arg4[%c0_118, %c0_119, %c176_120] : memref<1x8x256xf32, #tpu.memory_space<vmem>>, vector<1x8x16xf32>
    %113 = vector.shape_cast %112 : vector<1x8x16xf32> to vector<8x16xf32>
    %114 = vector.shape_cast %111 : vector<8x16xf32> to vector<1x8x16xf32>
    tpu.vector_store %arg4[%c0_118, %c0_119, %c176_120], %114 {strides = array<i32>} : memref<1x8x256xf32, #tpu.memory_space<vmem>>, vector<1x8x16xf32>,
    %c0_121 = arith.constant 0 : index
    %c216 = arith.constant 216 : index
    %115 = vector.load %arg6[%c0_121, %c216] : memref<8x384xf32, #tpu.memory_space<vmem>>, vector<8x16xf32>
    %c0_122 = arith.constant 0 : index
    %c0_123 = arith.constant 0 : index
    %c192_124 = arith.constant 192 : index
    %116 = vector.load %arg4[%c0_122, %c0_123, %c192_124] : memref<1x8x256xf32, #tpu.memory_space<vmem>>, vector<1x8x16xf32>
    %117 = vector.shape_cast %116 : vector<1x8x16xf32> to vector<8x16xf32>
    %118 = vector.shape_cast %115 : vector<8x16xf32> to vector<1x8x16xf32>
    tpu.vector_store %arg4[%c0_122, %c0_123, %c192_124], %118 {strides = array<i32>} : memref<1x8x256xf32, #tpu.memory_space<vmem>>, vector<1x8x16xf32>,
    %c0_125 = arith.constant 0 : index
    %c234 = arith.constant 234 : index
    %119 = vector.load %arg6[%c0_125, %c234] : memref<8x384xf32, #tpu.memory_space<vmem>>, vector<8x16xf32>
    %c0_126 = arith.constant 0 : index
    %c0_127 = arith.constant 0 : index
    %c208_128 = arith.constant 208 : index
    %120 = vector.load %arg4[%c0_126, %c0_127, %c208_128] : memref<1x8x256xf32, #tpu.memory_space<vmem>>, vector<1x8x16xf32>
    %121 = vector.shape_cast %120 : vector<1x8x16xf32> to vector<8x16xf32>
    %122 = vector.shape_cast %119 : vector<8x16xf32> to vector<1x8x16xf32>
    tpu.vector_store %arg4[%c0_126, %c0_127, %c208_128], %122 {strides = array<i32>} : memref<1x8x256xf32, #tpu.memory_space<vmem>>, vector<1x8x16xf32>,
    %c0_129 = arith.constant 0 : index
    %c252 = arith.constant 252 : index
    %123 = vector.load %arg6[%c0_129, %c252] : memref<8x384xf32, #tpu.memory_space<vmem>>, vector<8x16xf32>
    %c0_130 = arith.constant 0 : index
    %c0_131 = arith.constant 0 : index
    %c224_132 = arith.constant 224 : index
    %124 = vector.load %arg4[%c0_130, %c0_131, %c224_132] : memref<1x8x256xf32, #tpu.memory_space<vmem>>, vector<1x8x16xf32>
    %125 = vector.shape_cast %124 : vector<1x8x16xf32> to vector<8x16xf32>
    %126 = vector.shape_cast %123 : vector<8x16xf32> to vector<1x8x16xf32>
    tpu.vector_store %arg4[%c0_130, %c0_131, %c224_132], %126 {strides = array<i32>} : memref<1x8x256xf32, #tpu.memory_space<vmem>>, vector<1x8x16xf32>,
    %c0_133 = arith.constant 0 : index
    %c270 = arith.constant 270 : index
    %127 = vector.load %arg6[%c0_133, %c270] : memref<8x384xf32, #tpu.memory_space<vmem>>, vector<8x16xf32>
    %c0_134 = arith.constant 0 : index
    %c0_135 = arith.constant 0 : index
    %c240_136 = arith.constant 240 : index
    %128 = vector.load %arg4[%c0_134, %c0_135, %c240_136] : memref<1x8x256xf32, #tpu.memory_space<vmem>>, vector<1x8x16xf32>
    %129 = vector.shape_cast %128 : vector<1x8x16xf32> to vector<8x16xf32>
    %130 = vector.shape_cast %127 : vector<8x16xf32> to vector<1x8x16xf32>
    tpu.vector_store %arg4[%c0_134, %c0_135, %c240_136], %130 {strides = array<i32>} : memref<1x8x256xf32, #tpu.memory_space<vmem>>, vector<1x8x16xf32>,
    return
  }
  func.func @transform_0(%arg0: i32) -> (i32, i32, i32) {
    %c0_i32 = arith.constant 0 : i32
    %c0_i32_0 = arith.constant 0 : i32
    %c0_i32_1 = arith.constant 0 : i32
    return %arg0, %c0_i32, %c0_i32_0 : i32, i32, i32
  }
  func.func @transform_1(%arg0: i32) -> (i32, i32) {
    %c0_i32 = arith.constant 0 : i32
    %c0_i32_0 = arith.constant 0 : i32
    %c0_i32_1 = arith.constant 0 : i32
    return %c0_i32, %c0_i32_0 : i32, i32
  }
  func.func @transform_2(%arg0: i32) -> (i32, i32) {
    %c0_i32 = arith.constant 0 : i32
    %c0_i32_0 = arith.constant 0 : i32
    %c0_i32_1 = arith.constant 0 : i32
    return %c0_i32, %c0_i32_0 : i32, i32
  }
  func.func @transform_3(%arg0: i32) -> (i32, i32, i32) {
    %c0_i32 = arith.constant 0 : i32
    %c0_i32_0 = arith.constant 0 : i32
    %c0_i32_1 = arith.constant 0 : i32
    return %arg0, %c0_i32, %c0_i32_0 : i32, i32, i32
  }
}

</mosaic_0001>

<bundles_post_ra>
// kernel: tpu_custom_call.1
= control target key start
LH: loop header
LB: loop body
LE: loop exit
PB: predicated region body
PF: predicated region fallthrough
CT: control target
= control target key end

     0   :  { %8 = vsyncpa [#allocation5], 0  ;;  %s1463_s0 = inlined_call_operand.hbm [shape: f32[2,4,256], index: 0, kind: input, shape index: {}]   ;;  %s1464_s1 = inlined_call_operand.vmem [shape: f32[8,72], index: 1, kind: input, shape index: {}]   ;;  %s1465_s2 = inlined_call_operand.vmem [shape: f32[8,1], index: 2, kind: input, shape index: {}]   ;;  %s1466_s3 = inlined_call_operand.hbm [shape: f32[2,8,256], index: 3, kind: output, shape index: {}]  }
   0x1   :  { %10 = vsyncpa [#allocation5 + $0x1], 0 }
   0x2   :  { %11 = vsyncpa [#allocation6], 0 }
   0x3   :  { %13 = vsyncpa [#allocation6 + $0x1], 0  ;;  %s1174_s12 = smov 0   ;;  %s1176_s13 = smov 0  }
   0x4   :  { %s1178_s14 = smov 0   ;;  %s1180_s15 = smov 0  }
   0x5 LB: > { %s1195_s16 = sadd.s32 4294967295, %s1110_s15   ;;  %s790_s17 = sadd.s32 4294967294, %s1110_s15   ;;  %s1110_s15 = sphi %s1180_s15, %s1481_s15   ;;  %s1106_s14 = sphi %s1178_s14, %s1480_s14   ;;  %s1102_s13 = sphi %s1176_s13, %s1479_s13   ;;  %s1098_s12 = sphi %s1174_s12, %s1478_s12  }
   0x6   : > { %s1199_s18 = sadd.s32 1, %s1110_s15   ;;  %s26_s19 = sadd.s32 1, %s1106_s14 }
   0x7   : > { %s23_s20 = ssub.s32 %s1110_s15, %s1199_s18  ;;  %p33_p0 = scmp.ne.s32.totalorder %s1106_s14, %s1102_s13 }
   0x8   : > { %p24_p1 = scmp.eq.s32.totalorder %s23_s20, 0  ;;  %p34_p2 = scmp.eq.s32.totalorder %s1110_s15, 0 }
   0x9   : > { %p39_p3 = scmp.ne.s32.totalorder %s1102_s13, %s1098_s12  ;;  %p40_p4 = scmp.eq.s32.totalorder %s1195_s16, 0 }
   0xa   : > { %s1211_s21 = scalar_select %p24_p1, %s1106_s14, %s26_s19  }
   0xb   : > { %p1213_p5 = por %p34_p2, %p33_p0  ;;  %p1217_p6 = por %p40_p4, %p39_p3 }
   0xc   : > { %p105_p7 = scmp.eq.s32.totalorder %s1195_s16, 1  ;;  %p111_p8 = scmp.eq.s32.totalorder %s790_s17, 1 }
   0xd   : > { %p879_p10 = scmp.lt.s32.totalorder %s1110_s15, 2  ;;  %s137_s26 = sand.u32 1, %s1106_s14  }
   0xe   : > { %p1224_p11 = por %p105_p7, %p33_p0  ;;  %p1228_p12 = por %p111_p8, %p39_p3 }
   0xf   : > { %s806_s27 = sshll.u32 %s1110_s15, 7  ;;  %s793_s28 = sshll.u32 %s137_s26, 3 }
  0x10   : > { %s1470_s24 = scalar_select %p1224_p11, 1, 0 }
  0x11   : > { %s1471_s25 = scalar_select %p1228_p12, 1, 0 }
  0x12   : > { %s1237_s4 = scalar_lea.hbm %s1463_s0, %s806_s27  ;;  %s141_s5 = scalar_lea.vmem [#allocation4], %s793_s28 }
  0x13   : > { %s149_s6 = sshll.u32 %s141_s5, 4  ;;  %p1241_p13 = pnand %p879_p10, %p1213_p5  ;;  %s1245_s6 = int_to_ptr.vmem [resolvable:$true] %s149_s6 }
  0x14   : > { %s138_s8 = scalar_lea.sflag [#allocation5], %s137_s26  ;;  %s1014_s9 = scalar_lea.hbm %s1237_s4, 128 }
  0x15   : > { %p1015_p2 = scmp.ne.s32.totalorder %s1237_s4, %s1014_s9  ;;  %p1016_p3 = pneg %p1241_p13 }
  0x16   : > { %s1019_s17 = scalar_lea.hbm %s1463_s0, 256  ;;  %p1020_p5 = scmp.lt.u32.totalorder %s1237_s4, %s1463_s0 }
  0x17   : > { %p1017_p4 = pnand %p1016_p3, %p1015_p2  ;;  %p1021_p8 = scmp.lt.u32.totalorder %s1019_s17, %s1014_s9 }
  0x18   : > { %p1023_p9 = scmp.lt.u32.totalorder %s1014_s9, %s1237_s4 }
  0x19   : > { %p1018_p7 = pneg %p1017_p4  ;;  %p1022_p10 = por %p1021_p8, %p1020_p5 }
  0x1b   : > { %p1024_p0 = por %p1023_p9, %p1022_p10 }
  0x1d   : > { %p1025_p1 = pnand %p1024_p0, %p1018_p7 }
  0x1f   : > { %1028 = shalt.err (!%p1025_p1)
}
  0x20   : > { %s1029_s22 = scalar_lea.vmem %s1245_s6, 128  ;;  %s1112_s26 = smov [#allocation4]  }
  0x21   : > { %p1030_p2 = scmp.ne.s32.totalorder %s1245_s6, %s1029_s22  ;;  %s1034_s27 = sshll.u32 %s1112_s26, 4  ;;  %s1035_s27 = int_to_ptr.vmem [resolvable:$false] %s1034_s27 }
  0x22   : > { %s1036_s28 = scalar_lea.vmem %s1035_s27, 256  ;;  %p1037_p11 = scmp.lt.s32.totalorder %s1245_s6, %s1035_s27 }
  0x23   : > { %p1032_p4 = pnand %p1030_p2, %p1016_p3  ;;  %p1038_p5 = scmp.lt.s32.totalorder %s1036_s28, %s1029_s22 }
  0x25   : > { %p1033_p12 = pneg %p1032_p4  ;;  %p1039_p8 = por %p1038_p5, %p1037_p11 }
  0x27   : > { %p1040_p9 = pnand %p1039_p8, %p1033_p12 }
  0x29   : > { %1043 = shalt.err (!%p1040_p9)
}
  0x2a   : > { %874 = dma.hbm_to_vmem [thread:$0]  (!%p1241_p13), %s1237_s4, 128, %s1245_s6, %s138_s8  }
  0x2b   : > { %p1473_p0 = scmp.lt.s32.totalorder %s1110_s15, 3  ;;  %p1474_p1 = scmp.ge.s32.totalorder %s1110_s15, 1 }
  0x2d   : > { %p155_p3 = pnand %p1474_p1, %p1473_p0 }
  0x2e   : > { %s1279_s29 = sand.u32 (!%p155_p3), 1, %s1102_s13  }
  0x2f   : > { %158 = sbr.rel (%p155_p3) target bundleno = 740 (0x2e4), region = 32  ;;  %s797_s30 = sshll.u32 (!%p155_p3), %s1279_s29, 3 }
  0x30   : > { %s161_s5 = scalar_lea.sflag (!%p155_p3), [#allocation5], %s1279_s29  ;;  %s1283_s9 = scalar_lea.vmem (!%p155_p3), [#allocation4], %s797_s30 }
  0x36   : > { %1089 = dma.done.wait (%p1217_p6), %s161_s5, 128  }
  0x37   : > { %1091 = vsyncadd (%p1217_p6), %s161_s5, 4294967168  ;;  %v1113_v0 = vmov 0.0   ;;  %v240_v1 = vld [vmem:[%s1283_s9] sm:$0xf]  ;;  %s1114_s4 = smov 31   ;;  %s1115_s23 = smov 19  }
  0x38   : > { %188 = vst [vmem:[#allocation2 + $0x8] sm:$0xff] %v1113_v0  ;;  %187 = vst [vmem:[#allocation2] sm:$0xff] %v1113_v0  ;;  %513 = vmatprep.mubr.f32.mxu0 %v1113_v0  ;;  %v198_v2 = vld [vmem:[%s1283_s9] sm:$0xf]  ;;  %242 = vrot.lane.b32.xlu0 %v240_v1, %s1114_s4  ;;  %v256_v4 = vld [vmem:[%s1283_s9 + $0x4] sm:$0xf] }
  0x39   : > { %189 = vst [vmem:[#allocation2 + $0x10] sm:$0xff] %v1113_v0  ;;  %200 = vrot.lane.b32.xlu1 %v198_v2, %s1115_s23  ;;  %v249_v3 = vld [vmem:[%s1283_s9] sm:$0xf]  ;;  %s1116_s6 = smov 33   ;;  %s1117_s7 = smov 35   ;;  %vm247_vm0 = vcmask 117760  }
  0x3a   : > { %v205_v5 = vld [vmem:[%s1283_s9] sm:$0xf]  ;;  %v263_v6 = vld [vmem:[%s1283_s9 + $0x4] sm:$0xf]  ;;  %s1118_s8 = smov 21   ;;  %s1119_s10 = smov 37  }
  0x3b   : > { %v212_v7 = vld [vmem:[%s1283_s9] sm:$0xf]  ;;  %v270_v8 = vld [vmem:[%s1283_s9 + $0x4] sm:$0xf]  ;;  %s1120_s11 = smov 23   ;;  %s1121_s17 = smov 39  }
  0x3c   : > { %251 = vrot.lane.b32.xlu0 %v249_v3, %s1116_s6  ;;  %v219_v9 = vld [vmem:[%s1283_s9] sm:$0xf]  ;;  %v277_v10 = vld [vmem:[%s1283_s9 + $0x4] sm:$0xf]  ;;  %s1122_s19 = smov 25   ;;  %s1123_s20 = smov 41  }
  0x3d   : > { %258 = vrot.lane.b32.xlu1 %v256_v4, %s1117_s7  ;;  %v291_v11 = vld [vmem:[%s1283_s9 + $0x4] sm:$0xf]  ;;  %v226_v12 = vld [vmem:[%s1283_s9] sm:$0xf]  ;;  %s1124_s22 = smov 45   ;;  %s1125_s26 = smov 27  }
  0x3e   : > { %v284_v13 = vld [vmem:[%s1283_s9 + $0x4] sm:$0xf]  ;;  %s1126_s27 = smov 43   ;;  %s1127_s28 = smov 47   ;;  %v233_v15 = vld [vmem:[%s1283_s9] sm:$0xf] }
  0x3f   : > { %v300_v14 = vld [vmem:[%s1283_s9 + $0x4] sm:$0xf]  ;;  %s1128_s30 = smov 29   ;;  %s1129_s5 = smov 49   ;;  %vm203_vm1 = vcmask 281752   ;;  %vm254_vm2 = vcmask 265352  }
  0x40   : > { %207 = vrot.lane.b32.xlu0 %v205_v5, %s1118_s8  ;;  %v307_v16 = vld [vmem:[%s1283_s9 + $0x4] sm:$0xf]  ;;  %vm261_vm3 = vcmask 412952   ;;  %vm210_vm4 = vcmask 429352   ;;  %vm268_vm5 = vcmask 560552   ;;  %vm217_vm6 = vcmask 576952  }
  0x41   : > { %265 = vrot.lane.b32.xlu1 %v263_v6, %s1119_s10  ;;  %vm275_vm7 = vcmask 708152   ;;  %vm224_vm8 = vcmask 724552   ;;  %vm282_vm9 = vcmask 855752   ;;  %vm298_vm10 = vcmask 101376   ;;  %s1130_s9 = smov 126   ;;  %s1131_s4 = smov 127  }
  0x42   : > { %vm231_vm11 = vcmask 872152   ;;  %vm289_vm12 = vcmask 1003352   ;;  %vm305_vm13 = vcmask 248952   ;;  %vm296_vm14 = vcmask 1044456   ;;  %s1133_s23 = smov 109   ;;  %s1134_s6 = smov 110  }
  0x43   : > { %vm238_vm15 = vcmask 1019752   ;;  %v1132_v35 = vmov 0.0|0.0   ;;  %s1135_s7 = smov 92   ;;  %s1136_s8 = smov 108   ;;  %v1140_v39 = vmov 0   ;;  %v192_v40 = vld [vmem:[%s1465_s2] sm:$0xff] }
  0x44   : > { %214 = vrot.lane.b32.xlu0 %v212_v7, %s1120_s11  ;;  %855 = vmatprep.subr.bf16.mxu1 %v1132_v35  ;;  %s1137_s10 = smov 91   ;;  %s1139_s11 = smov 90  }
  0x45   : > { %272 = vrot.lane.b32.xlu1 %v270_v8, %s1121_s17  ;;  %1013 = vset.pattern.permute.xlu0 %v1140_v39  ;;  %s1150_s17 = smov 112   ;;  %p1475_p11 = scmp.ne.s32.totalorder %s1470_s24, 0 }
  0x48   : > { %221 = vrot.lane.b32.xlu0 %v219_v9, %s1122_s19  ;;  %s1151_s19 = smov 102  }
  0x49   : > { %279 = vrot.lane.b32.xlu1 %v277_v10, %s1123_s20 }
  0x4c   : > { %293 = vrot.lane.b32.xlu0 %v291_v11, %s1124_s22 }
  0x4d   : > { %228 = vrot.lane.b32.xlu1 %v226_v12, %s1125_s26  ;;  %s798_s26 = sshll.u32 %s1279_s29, 4 }
  0x50   : > { %286 = vrot.lane.b32.xlu0 %v284_v13, %s1126_s27  ;;  %s1380_s27 = scalar_lea.vmem [#allocation7], %s798_s26 }
  0x51   : > { %302 = vrot.lane.b32.xlu1 %v300_v14, %s1127_s28  ;;  %s1141_s28 = smov 100   ;;  %s720_s20 = sshll.u32 %s1380_s27, 4  ;;  %s1420_s20 = int_to_ptr.vmem [resolvable:$true] %s720_s20 }
  0x54   : > { %235 = vrot.lane.b32.xlu0 %v233_v15, %s1128_s30  ;;  %s1142_s30 = smov 124  }
  0x55   : > { %309 = vrot.lane.b32.xlu1 %v307_v16, %s1129_s5  ;;  %s1143_s5 = smov 114  }
  0xaa   : > { %v243_v17 = vpop.permute.xlu0 %242 }
  0xab   : > { %v201_v18 = vpop.permute.xlu1 %200  ;;  %248 = vst.msk [vmem:[#allocation2 + $0x8] sm:$0xf] %vm247_vm0, %v243_v17  ;;  %vm312_vm0 = vcmask 396552  }
  0xac   : > { %204 = vst.msk [vmem:[#allocation2] sm:$0xf] %vm203_vm1, %v201_v18  ;;  %vm245_vm1 = vcmask 1044472  }
  0xae   : > { %v252_v19 = vpop.permute.xlu0 %251 }
  0xaf   : > { %v259_v20 = vpop.permute.xlu1 %258  ;;  %255 = vst.msk [vmem:[#allocation2 + $0x8] sm:$0xf] %vm254_vm2, %v252_v19  ;;  %vm1138_vm2 = vmmov 0  }
  0xb0   : > { %262 = vst.msk [vmem:[#allocation2 + $0x8] sm:$0xf] %vm261_vm3, %v259_v20  ;;  %836 = vmatprep.mubr.msk.f32.mxu1 %vm1138_vm2, %v1113_v0  ;;  %vm333_vm3 = vcmask 1039360   ;;  %vm636_vm2 = vcmask 917248  }
  0xb2   : > { %v208_v21 = vpop.permute.xlu0 %207 }
  0xb3   : > { %v266_v22 = vpop.permute.xlu1 %265  ;;  %211 = vst.msk [vmem:[#allocation2] sm:$0xf] %vm210_vm4, %v208_v21  ;;  %vm348_vm4 = vcmask 1031168  }
  0xb4   : > { %269 = vst.msk [vmem:[#allocation2 + $0x8] sm:$0xf] %vm268_vm5, %v266_v22  ;;  %vm363_vm5 = vcmask 900096  }
  0xb6   : > { %v215_v23 = vpop.permute.xlu0 %214 }
  0xb7   : > { %v273_v24 = vpop.permute.xlu1 %272  ;;  %218 = vst.msk [vmem:[#allocation2] sm:$0xf] %vm217_vm6, %v215_v23  ;;  %vm378_vm6 = vcmask 891904  }
  0xb8   : > { %276 = vst.msk [vmem:[#allocation2 + $0x8] sm:$0xf] %vm275_vm7, %v273_v24  ;;  %vm393_vm7 = vcmask 883712  }
  0xba   : > { %v222_v25 = vpop.permute.xlu0 %221 }
  0xbb   : > { %v280_v26 = vpop.permute.xlu1 %279  ;;  %225 = vst.msk [vmem:[#allocation2] sm:$0xf] %vm224_vm8, %v222_v25  ;;  %vm408_vm8 = vcmask 752640  }
  0xbc   : > { %283 = vst.msk [vmem:[#allocation2 + $0x8] sm:$0xf] %vm282_vm9, %v280_v26  ;;  %vm423_vm9 = vcmask 744448  }
  0xbe   : > { %v294_v27 = vpop.permute.xlu0 %293 }
  0xbf   : > { %v229_v28 = vpop.permute.xlu1 %228  ;;  %299 = vst.msk [vmem:[#allocation2 + $0x10] sm:$0xf] %vm298_vm10, %v294_v27  ;;  %vm438_vm10 = vcmask 736256  }
  0xc0   : > { %232 = vst.msk [vmem:[#allocation2] sm:$0xf] %vm231_vm11, %v229_v28  ;;  %vm445_vm11 = vcmask 588800  }
  0xc2   : > { %v287_v29 = vpop.permute.xlu0 %286 }
  0xc3   : > { %v303_v30 = vpop.permute.xlu1 %302  ;;  %290 = vst.msk [vmem:[#allocation2 + $0x8] sm:$0xf] %vm289_vm12, %v287_v29  ;;  %vm594_vm12 = vcmask 130048  }
  0xc4   : > { %306 = vst.msk [vmem:[#allocation2 + $0x10] sm:$0xf] %vm305_vm13, %v303_v30  ;;  %vm601_vm13 = vcmask 261248  }
  0xc5   : > { %297 = vst.msk [vmem:[#allocation2 + $0x8] sm:$0xf] %vm296_vm14, %v294_v27  ;;  %vm608_vm14 = vcmask 392448  }
  0xc6   : > { %v236_v31 = vpop.permute.xlu0 %235 }
  0xc7   : > { %v310_v32 = vpop.permute.xlu1 %309  ;;  %239 = vst.msk [vmem:[#allocation2] sm:$0xf] %vm238_vm15, %v236_v31  ;;  %vm615_vm15 = vcmask 523648  }
  0xc8   : > { %313 = vst.msk [vmem:[#allocation2 + $0x10] sm:$0xf] %vm312_vm0, %v310_v32  ;;  %vm622_vm0 = vcmask 654848  }
  0xc9   : > { %246 = vst.msk [vmem:[#allocation2] sm:$0xf] %vm245_vm1, %v243_v17  ;;  %vm629_vm1 = vcmask 786048  }
  0xcc   : > { %v318_v37 = vld [vmem:[#allocation2 + $0x8] sm:$0xff] }
  0xcf   : > { %v1316_v36 = vld [vmem:[#allocation2 + $0x10] sm:$0xff] }
  0xd0   : > { %v1309_v33 = vld [vmem:[#allocation2] sm:$0xff]  ;;  %v978_v38 = vpack.i.bf16 %v1316_v36, %v318_v37 }
  0xd1   : > { %v958_v34 = vpack.i.bf16 %v1113_v0, %v1309_v33 }
  0xd3   : > { %959 = vrot.lane.b32.xlu0 %v958_v34, %s1130_s9  ;;  %954 = vrot.lane.b32.xlu1 %v958_v34, %s1131_s4 }
  0xd7   : > { %969 = vrot.lane.b32.xlu0 %v958_v34, %s1133_s23  ;;  %964 = vrot.lane.b32.xlu1 %v958_v34, %s1134_s6 }
  0xdb   : > { %400 = vrot.lane.b32.xlu0 %v1309_v33, %s1135_s7  ;;  %974 = vrot.lane.b32.xlu1 %v958_v34, %s1136_s8 }
  0xdf   : > { %979 = vrot.lane.b32.xlu0 %v978_v38, %s1131_s4  ;;  %415 = vrot.lane.b32.xlu1 %v1309_v33, %s1137_s10  ;;  %s1144_s4 = smov 122  }
  0xe3   : > { %984 = vrot.lane.b32.xlu0 %v978_v38, %s1130_s9  ;;  %989 = vrot.lane.b32.xlu1 %v978_v38, %s1134_s6 }
  0xe7   : > { %994 = vrot.lane.b32.xlu0 %v978_v38, %s1133_s23  ;;  %999 = vrot.lane.b32.xlu1 %v978_v38, %s1136_s8  ;;  %s1145_s23 = smov 120  }
  0xeb   : > { %1004 = vrot.lane.b32.xlu0 %v978_v38, %s1135_s7  ;;  %1009 = vrot.lane.b32.xlu1 %v978_v38, %s1137_s10 }
  0xef   : > { %406 = vrot.lane.b32.xlu0 %v1113_v0, %s1135_s7  ;;  %434 = vrot.lane.b32.xlu1 %v1316_v36, %s1139_s11  ;;  %s1147_s7 = smov 106  }
  0xf3   : > { %432 = vrot.lane.b32.xlu0 %v318_v37, %s1139_s11  ;;  %421 = vrot.lane.b32.xlu1 %v1113_v0, %s1137_s10  ;;  %s1148_s10 = smov 116  }
  0xf7   : > { %430 = vrot.lane.b32.xlu0 %v1309_v33, %s1139_s11  ;;  %436 = vrot.lane.b32.xlu1 %v1113_v0, %s1139_s11  ;;  %s1149_s11 = smov 104  }
  0xfb   : > { %195 = vperm.xlu0 %1013, %v192_v40  }
 0x145   : > { %v960_v41 = vpop.permute.xlu0 %959  ;;  %v955_v42 = vpop.permute.xlu1 %954 }
 0x146   : > { %v957_v49 = vunpack.i.h.bf16 %v955_v42  ;;  %v956_v50 = vunpack.i.l.bf16 %v955_v42  ;;  %v962_v56 = vunpack.i.h.bf16 %v960_v41  ;;  %v961_v3 = vunpack.i.l.bf16 %v960_v41 }
 0x149   : > { %v1334_v43 = vpop.permute.xlu0 %969  ;;  %v965_v44 = vpop.permute.xlu1 %964 }
 0x14a   : > { %v972_v4 = vunpack.i.h.bf16 %v1334_v43  ;;  %v967_v5 = vunpack.i.h.bf16 %v965_v44  ;;  %v966_v6 = vunpack.i.l.bf16 %v965_v44  ;;  %v971_v21 = vunpack.i.l.bf16 %v1334_v43 }
 0x14d   : > { %v1336_v45 = vpop.permute.xlu0 %400  ;;  %v1338_v46 = vpop.permute.xlu1 %974 }
 0x14e   : > { %v977_v7 = vunpack.i.h.bf16 %v1338_v46  ;;  %v976_v28 = vunpack.i.l.bf16 %v1338_v46 }
 0x151   : > { %v980_v47 = vpop.permute.xlu0 %979  ;;  %v1340_v48 = vpop.permute.xlu1 %415 }
 0x152   : > { %v982_v51 = vunpack.i.h.bf16 %v980_v47  ;;  %v981_v52 = vunpack.i.l.bf16 %v980_v47 }
 0x154   : > { %v335_v53 = vsel %vm333_vm3, %v981_v52, %v982_v51  ;;  %v336_v54 = vsel %vm333_vm3, %v982_v51, %v957_v49  ;;  %v334_v55 = vsel %vm333_vm3, %v956_v50, %v981_v52  ;;  %vm695_vm3 = vcmask 818176  }
 0x155   : > { %v985_v57 = vpop.permute.xlu0 %984  ;;  %v990_v58 = vpop.permute.xlu1 %989  ;;  %v839_v59 = vpack.c.bf16 %v335_v53, %v318_v37  ;;  %v856_v60 = vpack.c.bf16 %v336_v54, %v1316_v36  ;;  %v841_v61 = vpack.c.bf16 %v334_v55, %v1309_v33 }
 0x156   : > { %v987_v62 = vunpack.i.h.bf16 %v985_v57  ;;  %v986_v63 = vunpack.i.l.bf16 %v985_v57  ;;  %v992_v1 = vunpack.i.h.bf16 %v990_v58  ;;  %v991_v2 = vunpack.i.l.bf16 %v990_v58 }
 0x157   : > { %840 = vmatprep.subr.bf16.mxu0 %v839_v59  ;;  %857 = vmatpush3.bf16.msra.mxu1 %v856_v60 }
 0x158   : > { %842 = vmatpush1.bf16.msra.mxu0 %v841_v61  ;;  %858 = vmatprep.subr.bf16.mxu1 %v1132_v35  ;;  %v350_v8 = vsel %vm348_vm4, %v986_v63, %v987_v62  ;;  %v365_v9 = vsel %vm363_vm5, %v991_v2, %v992_v1  ;;  %v351_v10 = vsel %vm348_vm4, %v987_v62, %v962_v56 }
 0x159   : > { %v995_v11 = vpop.permute.xlu0 %994  ;;  %v1000_v12 = vpop.permute.xlu1 %999  ;;  %v843_v13 = vpack.c.bf16 %v365_v9, %v350_v8  ;;  %v366_v14 = vsel %vm363_vm5, %v992_v1, %v967_v5  ;;  %v349_v15 = vsel %vm348_vm4, %v961_v3, %v986_v63  ;;  %v364_v16 = vsel %vm363_vm5, %v966_v6, %v991_v2 }
 0x15a   : > { %v997_v17 = vunpack.i.h.bf16 %v995_v11  ;;  %v996_v18 = vunpack.i.l.bf16 %v995_v11  ;;  %v1002_v19 = vunpack.i.h.bf16 %v1000_v12  ;;  %v1001_v20 = vunpack.i.l.bf16 %v1000_v12 }
 0x15b   : > { %844 = vmatprep.subr.bf16.mxu0 %v843_v13  ;;  %v859_v22 = vpack.c.bf16 %v366_v14, %v351_v10  ;;  %v845_v23 = vpack.c.bf16 %v364_v16, %v349_v15  ;;  %vm649_vm4 = vcmask 1048448   ;;  %vm646_vm5 = vcmask 932864  }
 0x15c   : > { %v380_v24 = vsel %vm378_vm6, %v996_v18, %v997_v17  ;;  %v395_v25 = vsel %vm393_vm7, %v1001_v20, %v1002_v19  ;;  %v381_v26 = vsel %vm378_vm6, %v997_v17, %v972_v4  ;;  %v396_v27 = vsel %vm393_vm7, %v1002_v19, %v977_v7 }
 0x15d   : > { %860 = vmatpush3.bf16.msra.mxu1 %v859_v22  ;;  %846 = vmatpush1.bf16.msra.mxu0 %v845_v23  ;;  %v1005_v29 = vpop.permute.xlu0 %1004  ;;  %v1010_v30 = vpop.permute.xlu1 %1009  ;;  %v847_v31 = vpack.c.bf16 %v395_v25, %v380_v24  ;;  %v862_v32 = vpack.c.bf16 %v396_v27, %v381_v26  ;;  %v379_v33 = vsel %vm378_vm6, %v971_v21, %v996_v18 }
 0x15e   : > { %v1007_v34 = vunpack.i.h.bf16 %v1005_v29  ;;  %v1006_v36 = vunpack.i.l.bf16 %v1005_v29  ;;  %v1012_v37 = vunpack.i.h.bf16 %v1010_v30  ;;  %v1011_v38 = vunpack.i.l.bf16 %v1010_v30  ;;  %861 = vmatprep.subr.bf16.mxu1 %v1132_v35 }
 0x15f   : > { %848 = vmatprep.subr.bf16.mxu0 %v847_v31  ;;  %v394_v39 = vsel %vm393_vm7, %v976_v28, %v1001_v20 }
 0x160   : > { %v849_v40 = vpack.c.bf16 %v394_v39, %v379_v33  ;;  %v410_v41 = vsel %vm408_vm8, %v1006_v36, %v1007_v34  ;;  %v425_v42 = vsel %vm423_vm9, %v1011_v38, %v1012_v37  ;;  %v409_v43 = vsel %vm408_vm8, %v1336_v45, %v1006_v36 }
 0x161   : > { %863 = vmatpush3.bf16.msra.mxu1 %v862_v32  ;;  %v407_v44 = vpop.permute.xlu0 %406  ;;  %v435_v46 = vpop.permute.xlu1 %434  ;;  %v851_v47 = vpack.c.bf16 %v425_v42, %v410_v41  ;;  %v424_v49 = vsel %vm423_vm9, %v1340_v48, %v1011_v38 }
 0x162   : > { %850 = vmatpush1.bf16.msra.mxu0 %v849_v40  ;;  %v853_v50 = vpack.c.bf16 %v424_v49, %v409_v43  ;;  %864 = vmatprep.subr.bf16.mxu1 %v1132_v35  ;;  %v411_v53 = vsel %vm408_vm8, %v1007_v34, %v407_v44  ;;  %v191_v35 = vld [vmem:[%s1464_s1] sm:$0xff] }
 0x163   : > { %852 = vmatprep.subr.bf16.mxu0 %v851_v47 }
 0x165   : > { %v433_v51 = vpop.permute.xlu0 %432  ;;  %v422_v52 = vpop.permute.xlu1 %421 }
 0x166   : > { %854 = vmatpush1.bf16.msra.mxu0 %v853_v50  ;;  %v426_v45 = vsel %vm423_vm9, %v1012_v37, %v422_v52  ;;  %v440_v54 = vsel %vm438_vm10, %v433_v51, %v435_v46 }
 0x167   : > { %v865_v55 = vpack.c.bf16 %v426_v45, %v411_v53  ;;  %465 = vmatprep.subr.mxu0 %v440_v54 }
 0x169   : > { %v431_v56 = vpop.permute.xlu0 %430  ;;  %v437_v48 = vpop.permute.xlu1 %436  ;;  %866 = vmatpush3.bf16.msra.mxu1 %v865_v55 }
 0x16a   : > { %v439_v57 = vsel %vm438_vm10, %v431_v56, %v433_v51  ;;  %834 = vmatprep.subr.mxu1 %v1113_v0  ;;  %v441_v58 = vsel %vm438_vm10, %v435_v46, %v437_v48 }
 0x16b   : > { %466 = vmatpush1.msra.mxu0 %v439_v57 }
 0x16c   : > { %799 = vmatmul.mubr.msk.f32.vlgmr.msra.gmra.mrb[0].mxu0 %vm445_vm11, %v191_v35 }
 0x16d   : > { %835 = vmatpush3.msra.mxu1 %v441_v58 }
 0x16e   : > { %837 = vmatmul.mubr.msk.f32.vlgmr.msra.gmra.mrb[0].mxu1 %vm445_vm11, %v191_v35 }
 0x17a   : > { %v196_v59 = vpop.permute.xlu0 %195 }
 0x23f   : > { %v515_v60 = vpop.f32.mrb[0].mxu0 }
 0x240   : > { %v516_v61 = vadd.f32 %v515_v60, %v196_v59  ;;  %v517_v62 = vpop.f32.mrb[1].mxu0 }
 0x241   : > { %v586_v63 = vpop.f32.mrb[0].mxu1  ;;  %v518_v0 = vadd.f32 %v517_v62, %v196_v59 }
 0x242   : > { %v587_v1 = vadd.f32 %v586_v63, %v196_v59  ;;  %598 = vrot.lane.b32.xlu1 %v516_v61, %s1130_s9  ;;  %v838_v2 = vpop.f32.mrb[1].mxu1  ;;  %595 = vst.msk [vmem:[%s1380_s27] sm:$0xff] %vm594_vm12, %v516_v61  ;;  %s1146_s9 = smov 118  }
 0x244   : > { %693 = vrot.lane.b32.xlu0 %v587_v1, %s1141_s28 }
 0x246   : > { %605 = vrot.lane.b32.xlu1 %v516_v61, %s1142_s30  ;;  %s1044_s30 = scalar_lea.vmem %s1420_s20, 256 }
 0x247   : > { %p1045_p6 = scmp.ne.s32.totalorder %s1420_s20, %s1044_s30 }
 0x248   : > { %642 = vrot.lane.b32.xlu0 %v516_v61, %s1143_s5 }
 0x249   : > { %p1046_p12 = pnand %p1045_p6, %p1475_p11 }
 0x24a   : > { %612 = vrot.lane.b32.xlu1 %v516_v61, %s1144_s4 }
 0x24b   : > { %p1047_p13 = pneg %p1046_p12 }
 0x24c   : > { %659 = vrot.lane.b32.xlu0 %v518_v0, %s1134_s6  ;;  %s1152_s6 = smov 98  }
 0x24e   : > { %619 = vrot.lane.b32.xlu1 %v516_v61, %s1145_s23 }
 0x250   : > { %665 = vrot.lane.b32.xlu0 %v518_v0, %s1136_s8  ;;  %s807_s8 = sshll.u32 %s1195_s16, 8  ;;  %s706_s16 = scalar_lea.sflag [#allocation6], %s1279_s29 }
 0x252   : > { %626 = vrot.lane.b32.xlu1 %v516_v61, %s1146_s9 }
 0x254   : > { %671 = vrot.lane.b32.xlu0 %v518_v0, %s1147_s7 }
 0x256   : > { %633 = vrot.lane.b32.xlu1 %v516_v61, %s1148_s10 }
 0x258   : > { %677 = vrot.lane.b32.xlu0 %v518_v0, %s1149_s11 }
 0x25a   : > { %653 = vrot.lane.b32.xlu1 %v518_v0, %s1150_s17 }
 0x25c   : > { %683 = vrot.lane.b32.xlu0 %v518_v0, %s1151_s19 }
 0x25e   : > { %691 = vrot.lane.b32.xlu1 %v518_v0, %s1141_s28  ;;  %s1418_s28 = scalar_lea.hbm %s1466_s3, %s807_s8 }
 0x260   : > { %701 = vrot.lane.b32.xlu0 %v587_v1, %s1152_s6 }
 0x262   : > { %644 = vrot.lane.b32.xlu1 %v518_v0, %s1143_s5  ;;  %s1153_s5 = smov [#allocation7]  }
 0x263   : > { %s1048_s4 = sshll.u32 %s1153_s5, 4  ;;  %s1049_s4 = int_to_ptr.vmem [resolvable:$false] %s1048_s4 }
 0x264   : > { %s1050_s23 = scalar_lea.vmem %s1049_s4, 512  ;;  %p1051_p7 = scmp.lt.s32.totalorder %s1420_s20, %s1049_s4 }
 0x265   : > { %p1052_p10 = scmp.lt.s32.totalorder %s1050_s23, %s1044_s30 }
 0x267   : > { %p1053_p2 = por %p1052_p10, %p1051_p7 }
 0x269   : > { %p1054_p4 = pnand %p1053_p2, %p1047_p13 }
 0x2b4   : > { %v599_v3 = vpop.permute.xlu1 %598 }
 0x2b5   : > { %602 = vst.msk [vmem:[%s1380_s27] sm:$0xff] %vm601_vm13, %v599_v3 }
 0x2b6   : > { %v694_v4 = vpop.permute.xlu0 %693 }
 0x2b8   : > { %v606_v5 = vpop.permute.xlu1 %605 }
 0x2b9   : > { %609 = vst.msk [vmem:[%s1380_s27] sm:$0xff] %vm608_vm14, %v606_v5 }
 0x2ba   : > { %v643_v6 = vpop.permute.xlu0 %642 }
 0x2bc   : > { %v613_v7 = vpop.permute.xlu1 %612 }
 0x2bd   : > { %616 = vst.msk [vmem:[%s1380_s27] sm:$0xff] %vm615_vm15, %v613_v7 }
 0x2be   : > { %v660_v8 = vpop.permute.xlu0 %659 }
 0x2c0   : > { %v620_v9 = vpop.permute.xlu1 %619 }
 0x2c1   : > { %623 = vst.msk [vmem:[%s1380_s27] sm:$0xff] %vm622_vm0, %v620_v9 }
 0x2c2   : > { %v666_v10 = vpop.permute.xlu0 %665 }
 0x2c4   : > { %v627_v11 = vpop.permute.xlu1 %626 }
 0x2c5   : > { %630 = vst.msk [vmem:[%s1380_s27] sm:$0xff] %vm629_vm1, %v627_v11 }
 0x2c6   : > { %v672_v12 = vpop.permute.xlu0 %671 }
 0x2c8   : > { %v634_v13 = vpop.permute.xlu1 %633 }
 0x2c9   : > { %637 = vst.msk [vmem:[%s1380_s27] sm:$0xff] %vm636_vm2, %v634_v13 }
 0x2ca   : > { %v678_v14 = vpop.permute.xlu0 %677 }
 0x2cc   : > { %v654_v15 = vpop.permute.xlu1 %653 }
 0x2cd   : > { %656 = vst.msk [vmem:[%s1380_s27 + $0x8] sm:$0xff] %vm594_vm12, %v654_v15 }
 0x2ce   : > { %662 = vst.msk [vmem:[%s1380_s27 + $0x8] sm:$0xff] %vm601_vm13, %v660_v8  ;;  %v684_v16 = vpop.permute.xlu0 %683 }
 0x2cf   : > { %668 = vst.msk [vmem:[%s1380_s27 + $0x8] sm:$0xff] %vm608_vm14, %v666_v10 }
 0x2d0   : > { %674 = vst.msk [vmem:[%s1380_s27 + $0x8] sm:$0xff] %vm615_vm15, %v672_v12  ;;  %v692_v17 = vpop.permute.xlu1 %691 }
 0x2d1   : > { %680 = vst.msk [vmem:[%s1380_s27 + $0x8] sm:$0xff] %vm622_vm0, %v678_v14  ;;  %v696_v18 = vsel %vm695_vm3, %v692_v17, %v694_v4 }
 0x2d2   : > { %686 = vst.msk [vmem:[%s1380_s27 + $0x8] sm:$0xff] %vm629_vm1, %v684_v16  ;;  %v702_v19 = vpop.permute.xlu0 %701 }
 0x2d3   : > { %698 = vst.msk [vmem:[%s1380_s27 + $0x8] sm:$0xff] %vm636_vm2, %v696_v18 }
 0x2d4   : > { %704 = vst.msk [vmem:[%s1380_s27 + $0x8] sm:$0xff] %vm649_vm4, %v702_v19  ;;  %v645_v20 = vpop.permute.xlu1 %644 }
 0x2d5   : > { %v647_v21 = vsel %vm646_vm5, %v643_v6, %v645_v20 }
 0x2d6   : > { %650 = vst.msk [vmem:[%s1380_s27] sm:$0xff] %vm649_vm4, %v647_v21 }
 0x2d7   : > { %1057 = shalt.err (!%p1054_p4)
}
 0x2d8   : > { %s1058_s29 = scalar_lea.hbm %s1418_s28, 256  ;;  %s1062_s7 = scalar_lea.hbm %s1466_s3, 512 }
 0x2d9   : > { %p1059_p5 = scmp.ne.s32.totalorder %s1418_s28, %s1058_s29  ;;  %p1063_p0 = scmp.lt.u32.totalorder %s1418_s28, %s1466_s3 }
 0x2da   : > { %p1064_p1 = scmp.lt.u32.totalorder %s1062_s7, %s1058_s29  ;;  %p1066_p6 = scmp.lt.u32.totalorder %s1058_s29, %s1418_s28 }
 0x2db   : > { %p1060_p8 = pnand %p1059_p5, %p1475_p11 }
 0x2dc   : > { %p1065_p3 = por %p1064_p1, %p1063_p0 }
 0x2dd   : > { %p1061_p9 = pneg %p1060_p8 }
 0x2de   : > { %p1067_p12 = por %p1066_p6, %p1065_p3 }
 0x2e0   : > { %p1068_p13 = pnand %p1067_p12, %p1061_p9 }
 0x2e2   : > { %1071 = shalt.err (!%p1068_p13)
}
 0x2e3   : > { %869 = dma.vmem_to_hbm [thread:$0]  (%p1475_p11), %s1420_s20, 256, %s1418_s28, %s706_s16  }
 0x2e4 PF: > { %s732_s17 = sand.u32 1, %s1098_s12   ;;  %p1476_p7 = scmp.ne.s32.totalorder %s1471_s25, 0 }
 0x2e5   : > { %p1477_p10 = scmp.ge.s32.totalorder %s1110_s15, 2  ;;  %s733_s19 = scalar_lea.sflag [#allocation6], %s732_s17 }
 0x2e7   : > { %p876_p2 = pnand %p1477_p10, %p1476_p7 }
 0x2e9   : > { %1093 = dma.done.wait (!%p876_p2), %s733_s19, 256  }
 0x2ea   : > { %1095 = vsyncadd (!%p876_p2), %s733_s19, 4294967040  ;;  %p16_p4 = scmp.ge.s32.totalorder %s1199_s18, 4   ;;  %s1478_s12 = smov %s1102_s13 }
 0x2eb   : > { %s1479_s13 = smov %s1106_s14  ;;  %s1480_s14 = smov %s1211_s21 }
 0x2ec   : > { %s1481_s15 = smov %s1199_s18  ;;  %18 = sbr.rel (!%p16_p4) target bundleno = 5 (0x5), region = 77 }
 0x2f3   :  { %738 = vsyncpa [#allocation5], 1 }
 0x2f4   :  { %740 = vsyncpa [#allocation5 + $0x1], 1 }
 0x2f5   :  { %741 = vsyncpa [#allocation6], 1 }
 0x2f6   :  { %743 = vsyncpa [#allocation6 + $0x1], 1 }

</bundles_post_ra>
